<compile_context>
chip_gen: v7x
topology: tpu7x:2x2x1
jax: 0.10.0
libtpu: 0.0.40
codegen_flags: <defaults>
</compile_context>

<pallas_src>
import jax
import jax.numpy as jnp
from jax.experimental import pallas as pl
from jax.experimental.pallas import tpu as pltpu

EPS = 1e-5
_MiB = 1024 * 1024


# --------------------------------------------------------------------------
# Generation-aware VMEM / core-count policy.
# --------------------------------------------------------------------------
def _tpu_vmem_and_cores():
    """Return (physical VMEM bytes per TensorCore, TensorCores per chip).

    Uses pltpu.get_tpu_info() when available, falling back to a device_kind
    heuristic; every path has a safe conservative default.
    """
    kind = ""
    try:
        kind = jax.devices()[0].device_kind.lower()
    except Exception:  # pragma: no cover - defensive
        pass
    # TensorCores per chip: v7x and the megacore parts (v4, v5p) have 2;
    # v5e / v6e have 1.
    cores = 2 if any(tag in kind for tag in ("v7", "v4", "v5p")) else 1
    vmem = None
    try:
        vmem = getattr(pltpu.get_tpu_info(), "vmem_capacity_bytes", None)
    except Exception:  # pragma: no cover - defensive
        vmem = None
    if not vmem:
        vmem = 64 * _MiB if "v7" in kind else 128 * _MiB
    return int(vmem), cores


def _vmem_policy():
    """(pipelined-buffer budget, vmem_limit_bytes, tensorcores_per_chip)."""
    vmem_phys, cores = _tpu_vmem_and_cores()
    if vmem_phys >= 128 * _MiB:          # v5e / v6e / v4 / v5p
        return 40 * _MiB, 64 * _MiB, cores
    # v7x: 64 MiB per TC -> leave headroom for Mosaic internal scratch.
    return 18 * _MiB, 48 * _MiB, cores


def _round_down8(n):
    return max(8, (n // 8) * 8)


def _pick_tile_rows(R, D, itemsize, n_row_streams, n_f32_copies, buf_budget, cores):
    """Largest row tile whose double-buffered I/O streams plus f32 compute
    intermediates fit the VMEM buffer budget; keeps per-grid-step DMA large."""
    bytes_per_row = 2 * itemsize * D * n_row_streams + 4 * D * n_f32_copies
    tile = buf_budget // max(bytes_per_row, 1)
    tile = min(tile, R, 8192)            # roofline flat well before this cap
    tile = _round_down8(tile)
    if cores >= 2 and R >= 16:
        # Both TensorCores need work; prefer an even step count so neither
        # core idles on the last step.
        steps = pl.cdiv(R, tile)
        if steps < 2:
            steps = 2
        elif steps % 2 == 1:
            steps += 1
        tile = _round_down8(pl.cdiv(R, steps))
    return tile


# --------------------------------------------------------------------------
# Kernels.
# --------------------------------------------------------------------------
def _layernorm_rows(x, g, b):
    """Two-pass LayerNorm of an (TR, D) f32 tile; g/b are (1, D) f32."""
    inv_d = 1.0 / x.shape[-1]
    mean = jnp.sum(x, axis=-1, keepdims=True) * inv_d
    xc = x - mean
    var = jnp.sum(xc * xc, axis=-1, keepdims=True) * inv_d
    return xc * jax.lax.rsqrt(var + EPS) * g + b


def _ln_kernel(x_ref, g_ref, b_ref, o_ref):
    x = x_ref[...].astype(jnp.float32)
    o_ref[...] = _layernorm_rows(x, g_ref[...], b_ref[...]).astype(o_ref.dtype)


def _ln_add_kernel(x_ref, y_ref, g_ref, b_ref, o_ref):
    # Fused LayerNorm(x) + y  (residual-add `fn`), single HBM pass.
    x = x_ref[...].astype(jnp.float32)
    n = _layernorm_rows(x, g_ref[...], b_ref[...])
    o_ref[...] = (n + y_ref[...].astype(jnp.float32)).astype(o_ref.dtype)


# --------------------------------------------------------------------------
# Wrapper.
# --------------------------------------------------------------------------
def _layernorm_call(x2d, gamma, beta, y2d=None):
    """x2d: (R, D); gamma/beta: (D,) f32; optional y2d: (R, D) fused add."""
    R, D = x2d.shape
    itemsize = jnp.dtype(x2d.dtype).itemsize
    fused = y2d is not None
    n_row_streams = 3 if fused else 2       # (x [+ y]) + output, double-buffered
    n_f32_copies = 3 if fused else 2        # x_f32, normed, (y_f32)

    buf_budget, vmem_limit, cores = _vmem_policy()
    tile = _pick_tile_rows(R, D, itemsize, n_row_streams, n_f32_copies,
                           buf_budget, cores)

    # Ragged last block: out-of-bounds rows are read as unspecified values but
    # LayerNorm is per-row, and their stores are masked to the array bounds,
    # so no padding / output-slice copies are needed.
    grid = (pl.cdiv(R, tile),)

    gamma2 = gamma.reshape(1, D).astype(jnp.float32)
    beta2 = beta.reshape(1, D).astype(jnp.float32)

    row_spec = pl.BlockSpec((tile, D), lambda i: (i, 0))
    vec_spec = pl.BlockSpec((1, D), lambda i: (0, 0))   # constant block index

    if fused:
        kernel = _ln_add_kernel
        operands = (x2d, y2d, gamma2, beta2)
        in_specs = [row_spec, row_spec, vec_spec, vec_spec]
    else:
        kernel = _ln_kernel
        operands = (x2d, gamma2, beta2)
        in_specs = [row_spec, vec_spec, vec_spec]

    cost = pl.CostEstimate(
        flops=10 * R * D,                     # 2 reductions + scale/shift (+add)
        transcendentals=R,                    # one rsqrt per row
        bytes_accessed=n_row_streams * R * D * itemsize + 2 * D * 4,
    )

    return pl.pallas_call(
        kernel,
        out_shape=jax.ShapeDtypeStruct((R, D), x2d.dtype),
        grid_spec=pltpu.PrefetchScalarGridSpec(
            num_scalar_prefetch=0,
            grid=grid,
            in_specs=in_specs,
            out_specs=row_spec,
        ),
        compiler_params=pltpu.CompilerParams(
            dimension_semantics=("parallel",),
            vmem_limit_bytes=vmem_limit,
        ),
        cost_estimate=cost,
    )(*operands)


class PreNorm:
    """JAX/Pallas equivalent of the PyTorch PreNorm module.

    forward(x, y) == fn(LayerNorm(x), y).  When `fuse_residual_add=True` the
    common `fn(xn, y) = xn + y` case is fused into the LayerNorm kernel.
    """

    def __init__(self, dim, fn, *, fuse_residual_add=False):
        # nn.LayerNorm(dim) default init: weight=1, bias=0 (deterministic).
        self.dim = dim
        self.gamma = jnp.ones((dim,), dtype=jnp.float32)
        self.beta = jnp.zeros((dim,), dtype=jnp.float32)
        self.fn = fn
        self.fuse_residual_add = fuse_residual_add

    def __call__(self, x, y, **kwargs):
        # Original PyTorch forward ignores **kwargs: fn(norm(x), y).
        D = x.shape[-1]
        assert D == self.dim
        lead = x.shape[:-1]
        x2 = x.reshape(-1, D)
        if self.fuse_residual_add and y.shape == x.shape:
            y2 = y.reshape(-1, D)
            out = _layernorm_call(x2, self.gamma, self.beta, y2)
            return out.reshape(*lead, D)
        # TODO(synk): for a Pallas consumer (e.g. the cross-attention QKV
        # matmul) the LayerNorm should be fused into that kernel's LHS-tile
        # epilogue instead of round-tripping the normed tensor through HBM.
        normed = _layernorm_call(x2, self.gamma, self.beta).reshape(*lead, D)
        return self.fn(normed, y)


if __name__ == "__main__":
    key = jax.random.PRNGKey(0)
    kx, ky = jax.random.split(key)

    # Small demo shapes (correctness only; D=32 < 128 lanes is store-masked,
    # production dims should be multiples of 128 for lane-dense stores).
    B, S, D = 2, 8, 32
    x = jax.random.normal(kx, (B, S, D), dtype=jnp.float32)
    y = jax.random.normal(ky, (B, S, D), dtype=jnp.float32)

    # Plain-JAX LayerNorm reference (two-pass, matches PyTorch semantics).
    mean = jnp.mean(x, axis=-1, keepdims=True)
    var = jnp.mean((x - mean) ** 2, axis=-1, keepdims=True)
    ln_ref = (x - mean) * jax.lax.rsqrt(var + EPS)

    # 1) Fused path: fn = residual add, computed inside the kernel.
    add_fn = lambda xn, yy: xn + yy
    mod_fused = PreNorm(D, add_fn, fuse_residual_add=True)
    out_fused = jax.block_until_ready(mod_fused(x, y))
    ref_fused = add_fn(ln_ref * mod_fused.gamma + mod_fused.beta, y)
    assert jnp.max(jnp.abs(out_fused - ref_fused)) < 1e-4, "fused path mismatch"

    # 2) Generic path: arbitrary fn applied to the kernel's LayerNorm output.
    mul_fn = lambda xn, yy: xn * yy
    mod_gen = PreNorm(D, mul_fn)
    out_gen = jax.block_until_ready(mod_gen(x, y))
    ref_gen = mul_fn(ln_ref * mod_gen.gamma + mod_gen.beta, y)
    assert jnp.max(jnp.abs(out_gen - ref_gen)) < 1e-4, "generic path mismatch"

    print("KERNEL_OK")
</pallas_src>

<mosaic_0001>
module attributes {stable_mosaic.version = 11 : i64} {
  func.func @_ln_add_kernel(%arg0: i32, %arg1: memref<16x32xf32, #tpu.memory_space<vmem>>, %arg2: memref<16x32xf32, #tpu.memory_space<vmem>>, %arg3: memref<1x32xf32, #tpu.memory_space<vmem>>, %arg4: memref<1x32xf32, #tpu.memory_space<vmem>>, %arg5: memref<16x32xf32, #tpu.memory_space<vmem>>) attributes {dimension_semantics = [#tpu.dimension_semantics<parallel>], iteration_bounds = array<i64: 1>, scalar_prefetch = 0 : i64, scratch_operands = 0 : i64, tpu.core_type = #tpu.core_type<tc>, window_params = [{transform_indices = @transform_0, window_bounds = array<i64: 16, 32>}, {transform_indices = @transform_1, window_bounds = array<i64: 16, 32>}, {pipeline_mode = #tpu.pipeline_mode<synchronous>, transform_indices = @transform_2, window_bounds = array<i64: 1, 32>}, {pipeline_mode = #tpu.pipeline_mode<synchronous>, transform_indices = @transform_3, window_bounds = array<i64: 1, 32>}, {transform_indices = @transform_4, window_bounds = array<i64: 16, 32>}]} {
    %c0 = arith.constant 0 : index
    %c0_0 = arith.constant 0 : index
    %0 = vector.load %arg1[%c0, %c0_0] : memref<16x32xf32, #tpu.memory_space<vmem>>, vector<16x32xf32>
    %c0_1 = arith.constant 0 : index
    %c0_2 = arith.constant 0 : index
    %1 = vector.load %arg3[%c0_1, %c0_2] : memref<1x32xf32, #tpu.memory_space<vmem>>, vector<1x32xf32>
    %c0_3 = arith.constant 0 : index
    %c0_4 = arith.constant 0 : index
    %2 = vector.load %arg4[%c0_3, %c0_4] : memref<1x32xf32, #tpu.memory_space<vmem>>, vector<1x32xf32>
    %cst = arith.constant dense<0.000000e+00> : vector<16xf32>
    %3 = vector.multi_reduction <add>, %0, %cst [1] : vector<16x32xf32> to vector<16xf32>
    %4 = vector.shape_cast %3 : vector<16xf32> to vector<16x1xf32>
    %cst_5 = arith.constant 3.125000e-02 : f32
    %5 = vector.broadcast %cst_5 : f32 to vector<16x1xf32>
    %6 = arith.mulf %4, %5 : vector<16x1xf32>
    %7 = vector.broadcast %6 : vector<16x1xf32> to vector<16x32xf32>
    %8 = arith.subf %0, %7 : vector<16x32xf32>
    %9 = arith.mulf %8, %8 : vector<16x32xf32>
    %cst_6 = arith.constant dense<0.000000e+00> : vector<16xf32>
    %10 = vector.multi_reduction <add>, %9, %cst_6 [1] : vector<16x32xf32> to vector<16xf32>
    %11 = vector.shape_cast %10 : vector<16xf32> to vector<16x1xf32>
    %cst_7 = arith.constant 3.125000e-02 : f32
    %12 = vector.broadcast %cst_7 : f32 to vector<16x1xf32>
    %13 = arith.mulf %11, %12 : vector<16x1xf32>
    %cst_8 = arith.constant 9.99999974E-6 : f32
    %14 = vector.broadcast %cst_8 : f32 to vector<16x1xf32>
    %15 = arith.addf %13, %14 : vector<16x1xf32>
    %16 = math.rsqrt %15 : vector<16x1xf32>
    %17 = vector.broadcast %16 : vector<16x1xf32> to vector<16x32xf32>
    %18 = arith.mulf %8, %17 : vector<16x32xf32>
    %19 = vector.broadcast %1 : vector<1x32xf32> to vector<16x32xf32>
    %20 = arith.mulf %18, %19 : vector<16x32xf32>
    %21 = vector.broadcast %2 : vector<1x32xf32> to vector<16x32xf32>
    %22 = arith.addf %20, %21 : vector<16x32xf32>
    %c0_9 = arith.constant 0 : index
    %c0_10 = arith.constant 0 : index
    %23 = vector.load %arg2[%c0_9, %c0_10] : memref<16x32xf32, #tpu.memory_space<vmem>>, vector<16x32xf32>
    %24 = arith.addf %22, %23 : vector<16x32xf32>
    %c0_11 = arith.constant 0 : index
    %c0_12 = arith.constant 0 : index
    %25 = vector.load %arg5[%c0_11, %c0_12] : memref<16x32xf32, #tpu.memory_space<vmem>>, vector<16x32xf32>
    tpu.vector_store %arg5[%c0_11, %c0_12], %24 {strides = array<i32>} : memref<16x32xf32, #tpu.memory_space<vmem>>, vector<16x32xf32>,
    return
  }
  func.func @transform_0(%arg0: i32) -> (i32, i32) {
    %c0_i32 = arith.constant 0 : i32
    %c0_i32_0 = arith.constant 0 : i32
    return %arg0, %c0_i32 : i32, i32
  }
  func.func @transform_1(%arg0: i32) -> (i32, i32) {
    %c0_i32 = arith.constant 0 : i32
    %c0_i32_0 = arith.constant 0 : i32
    return %arg0, %c0_i32 : i32, i32
  }
  func.func @transform_2(%arg0: i32) -> (i32, i32) {
    %c0_i32 = arith.constant 0 : i32
    %c0_i32_0 = arith.constant 0 : i32
    %c0_i32_1 = arith.constant 0 : i32
    return %c0_i32, %c0_i32_0 : i32, i32
  }
  func.func @transform_3(%arg0: i32) -> (i32, i32) {
    %c0_i32 = arith.constant 0 : i32
    %c0_i32_0 = arith.constant 0 : i32
    %c0_i32_1 = arith.constant 0 : i32
    return %c0_i32, %c0_i32_0 : i32, i32
  }
  func.func @transform_4(%arg0: i32) -> (i32, i32) {
    %c0_i32 = arith.constant 0 : i32
    %c0_i32_0 = arith.constant 0 : i32
    return %arg0, %c0_i32 : i32, i32
  }
}

</mosaic_0001>

<bundles_post_ra>
// kernel: tpu_custom_call.1
= control target key start
LH: loop header
LB: loop body
LE: loop exit
PB: predicated region body
PF: predicated region fallthrough
CT: control target
= control target key end

     0   :  { %9 = vsyncpa [#allocation3], 0  ;;  %s386_s0 = inlined_call_operand.hbm [shape: f32[16,32], index: 0, kind: input, shape index: {}]   ;;  %s387_s1 = inlined_call_operand.hbm [shape: f32[16,32], index: 1, kind: input, shape index: {}]   ;;  %s388_s2 = inlined_call_operand.hbm [shape: f32[1,32], index: 2, kind: input, shape index: {}]   ;;  %s389_s3 = inlined_call_operand.hbm [shape: f32[1,32], index: 3, kind: input, shape index: {}]   ;;  %s390_s4 = inlined_call_operand.hbm [shape: f32[16,32], index: 4, kind: output, shape index: {}]  }
   0x1   :  { %10 = vsyncpa [#allocation6], 0 }
   0x2   :  { %11 = vsyncpa [#allocation9], 0 }
   0x3   :  { %12 = vsyncpa [#allocation4], 0  ;;  %s272_s15 = smov [#allocation5]   ;;  %s273_s17 = smov [#allocation2]  }
   0x4   :  { %s30_s16 = sshll.u32 %s272_s15, 4  ;;  %s18_s18 = sshll.u32 %s273_s17, 4  ;;  %s31_s16 = int_to_ptr.vmem [resolvable:$true] %s30_s16  ;;  %s304_s18 = int_to_ptr.vmem [resolvable:$true] %s18_s18 }
   0x5   :  { %s154_s21 = scalar_lea.hbm %s387_s1, 256 }
   0x6   :  { %p155_p0 = scmp.ne.s32.totalorder %s387_s1, %s154_s21  ;;  %p158_p1 = scmp.lt.u32.totalorder %s154_s21, %s387_s1 }
   0x8   :  { %p160_p2 = pnand %p158_p1, %p155_p0 }
   0xa   :  { %163 = shalt.err (!%p160_p2)
}
   0xb   :  { %s164_s26 = scalar_lea.vmem %s31_s16, 256  ;;  %p169_p4 = scmp.lt.s32.totalorder %s31_s16, %s31_s16 }
   0xc   :  { %p165_p3 = scmp.ne.s32.totalorder %s31_s16, %s164_s26  ;;  %p170_p5 = scmp.lt.s32.totalorder %s164_s26, %s164_s26 }
   0xe   :  { %p171_p6 = por %p170_p5, %p169_p4 }
  0x10   :  { %p172_p7 = pnand %p171_p6, %p165_p3 }
  0x12   :  { %175 = shalt.err (!%p172_p7)
}
  0x13   :  { %s274_s27 = smov 128   ;;  %s275_s28 = smov 8  }
  0x14   :  { %36 = dma.hbm_to_vmem [thread:$0]  %s387_s1, 256, %s31_s16, [#allocation6], %s274_s27, %s274_s27, %s275_s28  }
  0x15   :  { %s176_s7 = scalar_lea.hbm %s386_s0, 256 }
  0x16   :  { %p177_p8 = scmp.ne.s32.totalorder %s386_s0, %s176_s7  ;;  %p180_p9 = scmp.lt.u32.totalorder %s176_s7, %s386_s0 }
  0x18   :  { %p182_p10 = pnand %p180_p9, %p177_p8 }
  0x1a   :  { %185 = shalt.err (!%p182_p10)
}
  0x1b   :  { %s186_s12 = scalar_lea.vmem %s304_s18, 256  ;;  %p191_p12 = scmp.lt.s32.totalorder %s304_s18, %s304_s18 }
  0x1c   :  { %p187_p11 = scmp.ne.s32.totalorder %s304_s18, %s186_s12  ;;  %p192_p13 = scmp.lt.s32.totalorder %s186_s12, %s186_s12 }
  0x1e   :  { %p193_p0 = por %p192_p13, %p191_p12 }
  0x20   :  { %p194_p1 = pnand %p193_p0, %p187_p11 }
  0x22   :  { %197 = shalt.err (!%p194_p1)
}
  0x23   :  { %24 = dma.hbm_to_vmem [thread:$0]  %s386_s0, 256, %s304_s18, [#allocation3], %s274_s27, %s274_s27, %s275_s28  }
  0x24   :  { %s276_s14 = smov [#allocation7]   ;;  %s277_s16 = smov [#allocation8]  }
  0x25   :  { %s43_s15 = sshll.u32 %s276_s14, 4  ;;  %s53_s17 = sshll.u32 %s277_s16, 4  ;;  %s44_s15 = int_to_ptr.vmem [resolvable:$true] %s43_s15  ;;  %s54_s17 = int_to_ptr.vmem [resolvable:$true] %s53_s17 }
  0x26   :  { %s198_s21 = scalar_lea.hbm %s388_s2, 16 }
  0x27   :  { %p199_p2 = scmp.ne.s32.totalorder %s388_s2, %s198_s21  ;;  %p202_p3 = scmp.lt.u32.totalorder %s198_s21, %s388_s2 }
  0x29   :  { %p204_p4 = pnand %p202_p3, %p199_p2 }
  0x2b   :  { %207 = shalt.err (!%p204_p4)
}
  0x2c   :  { %s208_s0 = scalar_lea.vmem %s44_s15, 16  ;;  %s212_s18 = scalar_lea.vmem %s44_s15, 32 }
  0x2d   :  { %p209_p5 = scmp.ne.s32.totalorder %s44_s15, %s208_s0  ;;  %p213_p6 = scmp.lt.s32.totalorder %s44_s15, %s44_s15 }
  0x2e   :  { %p214_p7 = scmp.lt.s32.totalorder %s212_s18, %s208_s0 }
  0x30   :  { %p215_p8 = por %p214_p7, %p213_p6 }
  0x32   :  { %p216_p9 = pnand %p215_p8, %p209_p5 }
  0x34   :  { %219 = shalt.err (!%p216_p9)
}
  0x35   :  { %46 = dma.hbm_to_vmem [thread:$0]  %s388_s2, 16, %s44_s15, [#allocation6]  }
  0x36   :  { %s220_s6 = scalar_lea.hbm %s389_s3, 16 }
  0x37   :  { %p221_p10 = scmp.ne.s32.totalorder %s389_s3, %s220_s6  ;;  %p224_p11 = scmp.lt.u32.totalorder %s220_s6, %s389_s3 }
  0x39   :  { %p226_p12 = pnand %p224_p11, %p221_p10 }
  0x3b   :  { %229 = shalt.err (!%p226_p12)
}
  0x3c   :  { %s230_s11 = scalar_lea.vmem %s54_s17, 16  ;;  %s234_s12 = scalar_lea.vmem %s54_s17, 32 }
  0x3d   :  { %p231_p13 = scmp.ne.s32.totalorder %s54_s17, %s230_s11  ;;  %p235_p0 = scmp.lt.s32.totalorder %s54_s17, %s54_s17 }
  0x3e   :  { %p236_p1 = scmp.lt.s32.totalorder %s234_s12, %s230_s11 }
  0x40   :  { %p237_p2 = por %p236_p1, %p235_p0 }
  0x42   :  { %p238_p3 = pnand %p237_p2, %p231_p13 }
  0x44   :  { %241 = shalt.err (!%p238_p3)
}
  0x45   :  { %56 = dma.hbm_to_vmem [thread:$0]  %s389_s3, 16, %s54_s17, [#allocation9]  }
  0x46   :  { %264 = dma.done.wait [#allocation3], 256  }
  0x47   :  { %265 = vsyncadd [#allocation3], 4294967040 }
  0x48   :  { %266 = dma.done.wait [#allocation6], 272  }
  0x49   :  { %267 = vsyncadd [#allocation6], 4294967024 }
  0x4a   :  { %268 = dma.done.wait [#allocation9], 16  }
  0x4b   :  { %269 = vsyncadd [#allocation9], 4294967280  ;;  %vm73_vm0 = vcmask 261120   ;;  %v69_v0 = vld [vmem:[#allocation2] sm:$0xff]  ;;  %v70_v1 = vld [vmem:[#allocation2 + $0x8] sm:$0xff]  ;;  %s278_s3 = smov [#allocation10]  }
  0x4c   :  { %v74_v2 = vsel %vm73_vm0, %v69_v0, 0.0  ;;  %v77_v3 = vsel %vm73_vm0, %v70_v1, 0.0  ;;  %v141_v21 = vld [vmem:[#allocation7] ss:$0 sm:$0xff]  ;;  %v142_v23 = vld [vmem:[#allocation8] ss:$0 sm:$0xff] }
  0x4d   :  { %75 = vadd.xlane.f32.xlu0 %v74_v2  ;;  %v116_v26 = vld [vmem:[#allocation5] sm:$0xff]  ;;  %v117_v31 = vld [vmem:[#allocation5 + $0x8] sm:$0xff]  ;;  %s127_s13 = sshll.u32 %s278_s3, 4  ;;  %s128_s13 = int_to_ptr.vmem [resolvable:$true] %s127_s13 }
  0x4e   :  { %s242_s14 = scalar_lea.vmem %s128_s13, 256  ;;  %p247_p5 = scmp.lt.s32.totalorder %s128_s13, %s128_s13 }
  0x4f   :  { %p243_p4 = scmp.ne.s32.totalorder %s128_s13, %s242_s14  ;;  %p248_p6 = scmp.lt.s32.totalorder %s242_s14, %s242_s14 }
  0x51   :  { %78 = vadd.xlane.f32.xlu0 %v77_v3  ;;  %p249_p7 = por %p248_p6, %p247_p5 }
  0x53   :  { %p250_p8 = pnand %p249_p7, %p243_p4 }
  0xda   :  { %v76_v4 = vpop.xlane.xlu0 %75 }
  0xdb   :  { %v80_v5 = vmul.f32 0.03125, %v76_v4 }
  0xdd   :  { %v82_v6 = vsub.f32 %v69_v0, %v80_v5 }
  0xde   :  { %v79_v7 = vpop.xlane.xlu0 %78 }
  0xdf   :  { %v81_v8 = vmul.f32 0.03125, %v79_v7  ;;  %v84_v9 = vmul.f32 %v82_v6, %v82_v6 }
  0xe1   :  { %v83_v10 = vsub.f32 %v70_v1, %v81_v8  ;;  %v86_v11 = vsel %vm73_vm0, %v84_v9, 0.0 }
  0xe2   :  { %87 = vadd.xlane.f32.xlu1 %v86_v11 }
  0xe3   :  { %v85_v12 = vmul.f32 %v83_v10, %v83_v10 }
  0xe5   :  { %v89_v13 = vsel %vm73_vm0, %v85_v12, 0.0 }
  0xe6   :  { %90 = vadd.xlane.f32.xlu1 %v89_v13 }
 0x16f   :  { %v88_v14 = vpop.xlane.xlu1 %87 }
 0x170   :  { %v92_v15 = vmul.f32 0.03125, %v88_v14 }
 0x172   :  { %v94_v16 = vadd.f32 1e-05, %v92_v15 }
 0x173   :  { %v91_v17 = vpop.xlane.xlu1 %90 }
 0x174   :  { %150 = vrsqrt.f32 %v94_v16  ;;  %v93_v18 = vmul.f32 0.03125, %v91_v17 }
 0x176   :  { %v95_v19 = vadd.f32 1e-05, %v93_v18 }
 0x178   :  { %152 = vrsqrt.f32 %v95_v19 }
 0x17e   :  { %v151_v20 = vpop.eup %150 }
 0x17f   :  { %v98_v22 = vmul.f32 %v151_v20, %v82_v6 }
 0x181   :  { %v106_v24 = vmul.f32 %v141_v21, %v98_v22 }
 0x182   :  { %v153_v25 = vpop.eup %152 }
 0x183   :  { %v99_v27 = vmul.f32 %v153_v25, %v83_v10  ;;  %v114_v28 = vadd.f32 %v142_v23, %v106_v24 }
 0x185   :  { %v107_v29 = vmul.f32 %v141_v21, %v99_v27  ;;  %v118_v30 = vadd.f32 %v116_v26, %v114_v28 }
 0x187   :  { %v115_v32 = vadd.f32 %v142_v23, %v107_v29  ;;  %120 = vst.msk [vmem:[#allocation10] sm:$0xff] %vm73_vm0, %v118_v30 }
 0x189   :  { %v119_v33 = vadd.f32 %v117_v31, %v115_v32 }
 0x18b   :  { %121 = vst.msk [vmem:[#allocation10 + $0x8] sm:$0xff] %vm73_vm0, %v119_v33 }
 0x18c   :  { %253 = shalt.err (!%p250_p8)
}
 0x18d   :  { %s254_s17 = scalar_lea.hbm %s390_s4, 256 }
 0x18e   :  { %p255_p9 = scmp.ne.s32.totalorder %s390_s4, %s254_s17  ;;  %p258_p10 = scmp.lt.u32.totalorder %s254_s17, %s390_s4 }
 0x190   :  { %p260_p11 = pnand %p258_p10, %p255_p9 }
 0x192   :  { %263 = shalt.err (!%p260_p11)
}
 0x193   :  { %133 = dma.vmem_to_hbm [thread:$0]  %s128_s13, 256, %s390_s4, [#allocation4], %s274_s27, %s274_s27, %s275_s28  }
 0x194   :  { %270 = dma.done.wait [#allocation4], 256  }
 0x195   :  { %271 = vsyncadd [#allocation4], 4294967040 }
 0x196   :  { %137 = vsyncpa [#allocation3], 1 }
 0x197   :  { %138 = vsyncpa [#allocation6], 1 }
 0x198   :  { %139 = vsyncpa [#allocation9], 1 }
 0x199   :  { %140 = vsyncpa [#allocation4], 1 }

</bundles_post_ra>
